<compile_context>
chip_gen: v6e
topology: v6e:2x2x1
jax: 0.10.0
libtpu: 0.0.40
codegen_flags: <defaults>
</compile_context>

<pallas_src>
import jax
import jax.numpy as jnp
from jax.experimental import pallas as pl
from jax.experimental.pallas import tpu as pltpu

EPS = 1e-5


# ----------------------------------------------------------------------------- kernel
def fusion_kernel(x_ref, llm_ref, w1_ref, w2_ref, wl_ref, woh_ref, wol_ref,
                  bias_ref, out_ref):
    d1 = w1_ref.shape[1]
    d2 = w2_ref.shape[1]
    n_out = out_ref.shape[1]

    # Inputs arrive in their producer dtype (f32 here, ideally bf16 from the LLM).
    # Cast per-tile in VMEM right before the MXU dots; no wrapper-side astype pass.
    x = x_ref[...].astype(jnp.bfloat16)      # (tb, mlp_input_dim)
    llm = llm_ref[...].astype(jnp.bfloat16)  # (tb, 896)

    # packed biases: row 0 = b1 (d1), row 1 = b2 (d2), row 2 = bo (n_out); zero-padded
    b1 = bias_ref[0:1, :d1]
    b2 = bias_ref[1:2, :d2]
    bo = bias_ref[2:3, :n_out]

    # ---- MLP branch (BN1/BN2 folded into weights+biases; dropout = identity in eval)
    h1 = jnp.dot(x, w1_ref[...], preferred_element_type=jnp.float32) + b1
    h1 = jnp.maximum(h1, 0.0)                                          # f32 VPU
    h2 = jnp.dot(h1.astype(jnp.bfloat16), w2_ref[...],
                 preferred_element_type=jnp.float32) + b2
    h2 = jnp.maximum(h2, 0.0)                                          # (tb, d2) f32

    # ---- LLM projection branch (bias folded downstream; bf16 MXU, f32 accumulate)
    lp = jnp.dot(llm, wl_ref[...], preferred_element_type=jnp.float32)  # (tb, dl) f32

    # ---- fused BN + linear_out, concat eliminated via split weight
    out = (jnp.dot(h2, woh_ref[...], preferred_element_type=jnp.float32)
           + jnp.dot(lp, wol_ref[...], preferred_element_type=jnp.float32)
           + bo)
    out_ref[...] = out.astype(out_ref.dtype)                           # (tb, 2)


# ----------------------------------------------------------------------------- folding
def fold_params(p):
    """Fold eval-mode BatchNorms (and self.linear's bias) into the linear layers and
    pack the remaining biases.  Done once, outside the kernel."""
    def bn_scale(g, v):
        return g * jax.lax.rsqrt(v + EPS)                       # (1, C)

    # bn1 -> fc1
    s1 = bn_scale(p["g1"], p["v1"])
    w1f = p["w1"] * s1                                          # (in, d1)
    b1f = (p["b1"] - p["m1"]) * s1 + p["be1"]                   # (1, d1)

    # bn2 -> fc2
    s2 = bn_scale(p["g2"], p["v2"])
    w2f = p["w2"] * s2                                          # (d1, d2)
    b2f = (p["b2"] - p["m2"]) * s2 + p["be2"]                   # (1, d2)

    # fused-rep bn -> linear_out  (affine ∘ affine), then split wo across the concat
    sf = bn_scale(p["gf"], p["vf"])                             # (1, d2+dl)
    wo_f = sf.T * p["wo"]                                       # (d2+dl, 2)
    d2 = p["w2"].shape[1]
    wo_h = wo_f[:d2]                                            # (d2, 2)
    wo_l = wo_f[d2:]                                            # (dl, 2)
    bo_f = (p["bef"] - p["mf"] * sf) @ p["wo"] + p["bo"]        # (1, 2)
    bo_f = bo_f + p["bl"] @ wo_l                                # fold self.linear bias

    # pack the three remaining biases into one operand (one DMA, one VMEM tile)
    d1 = w1f.shape[1]
    n_out = bo_f.shape[1]
    width = max(d1, d2, n_out)

    def pad_row(v):
        return jnp.pad(v, ((0, 0), (0, width - v.shape[1])))

    bias_pack = jnp.concatenate(
        [pad_row(b1f), pad_row(b2f), pad_row(bo_f)], axis=0).astype(jnp.float32)

    # bf16 for all pure-MXU weight operands (halves their DMA + resident VMEM);
    # the tiny output weights and biases stay f32.
    return dict(w1=w1f.astype(jnp.bfloat16), w2=w2f.astype(jnp.bfloat16),
                wl=p["wl"].astype(jnp.bfloat16),
                woh=wo_h.astype(jnp.float32), wol=wo_l.astype(jnp.float32),
                bias=bias_pack)


# ----------------------------------------------------------------------------- wrapper
def _round_up(n, m):
    return ((n + m - 1) // m) * m


def fusion_forward(x_tabular, llm_last_hidden, folded, *, batch_block=1024):
    """Single pallas_call with a parallel batch grid; weights broadcast across it.

    Note (review): at B<=64 this call is dominated by launch + one-time weight DMA;
    the Pallas win only materializes at large B or when fused with surrounding work.
    """
    B, d_in = x_tabular.shape
    llm_h = llm_last_hidden.shape[1]
    w1, w2, wl = folded["w1"], folded["w2"], folded["wl"]
    woh, wol, bias = folded["woh"], folded["wol"], folded["bias"]
    d1, d2, dl, n_out = w1.shape[1], w2.shape[1], wl.shape[1], woh.shape[1]

    # ---- batch tile selection (multiple of 8 whenever tb < B)
    tb = B if B <= batch_block else batch_block
    if B > 512:
        # v7x: guarantee >= 2 grid steps so ("parallel",) shards across both TensorCores.
        tb = min(tb, _round_up(pl.cdiv(B, 2), 8))
    grid = (pl.cdiv(B, tb),)

    flops = 2 * B * (d_in * d1 + d1 * d2 + llm_h * dl + d2 * n_out + dl * n_out)
    bytes_accessed = (x_tabular.nbytes + llm_last_hidden.nbytes + w1.nbytes + w2.nbytes
                      + wl.nbytes + woh.nbytes + wol.nbytes + bias.nbytes
                      + B * n_out * 4)

    # v5e scoped-VMEM default is 16 MiB; raise it only when the (double-buffered)
    # working set needs it.  Cap at 64 MiB (v7x physical VMEM per TensorCore).
    itemsize = x_tabular.dtype.itemsize
    llm_itemsize = llm_last_hidden.dtype.itemsize
    vmem_est = int(2 * tb * (d_in * itemsize + llm_h * llm_itemsize + n_out * 4)
                   + 2 * (w1.nbytes + w2.nbytes + wl.nbytes + woh.nbytes
                          + wol.nbytes + bias.nbytes)
                   + (2 << 20))
    cp_kwargs = dict(dimension_semantics=("parallel",))
    if vmem_est > (16 << 20):
        cp_kwargs["vmem_limit_bytes"] = min(vmem_est, 64 << 20)

    def full_spec(a):
        return pl.BlockSpec(a.shape, lambda i: (0, 0))

    return pl.pallas_call(
        fusion_kernel,
        out_shape=jax.ShapeDtypeStruct((B, n_out), jnp.float32),
        grid=grid,
        in_specs=[
            pl.BlockSpec((tb, d_in), lambda i: (i, 0)),
            pl.BlockSpec((tb, llm_h), lambda i: (i, 0)),
            full_spec(w1), full_spec(w2), full_spec(wl),
            full_spec(woh), full_spec(wol), full_spec(bias),
        ],
        out_specs=pl.BlockSpec((tb, n_out), lambda i: (i, 0)),
        compiler_params=pltpu.CompilerParams(**cp_kwargs),
        cost_estimate=pl.CostEstimate(flops=flops, transcendentals=0,
                                      bytes_accessed=bytes_accessed),
    )(x_tabular, llm_last_hidden, w1, w2, wl, woh, wol, bias)


# ----------------------------------------------------------------------------- params / reference
def make_params(key, mlp_input_dim, mlp_dim1, mlp_dim2, llm_proj_dim, llm_hidden=896):
    ks = jax.random.split(key, 16)
    f32 = jnp.float32

    def lin(kw, kb, din, dout):
        w = (0.02 * jax.random.normal(kw, (din, dout))).astype(f32)   # (in, out) layout
        b = (0.01 * jax.random.normal(kb, (1, dout))).astype(f32)
        return w, b

    def bn(kg, kb, km, kv, dim):
        g = (1.0 + 0.05 * jax.random.normal(kg, (1, dim))).astype(f32)
        be = (0.02 * jax.random.normal(kb, (1, dim))).astype(f32)
        m = (0.1 * jax.random.normal(km, (1, dim))).astype(f32)
        v = (0.5 + jnp.abs(jax.random.normal(kv, (1, dim)))).astype(f32)
        return g, be, m, v

    w1, b1 = lin(ks[0], ks[1], mlp_input_dim, mlp_dim1)
    g1, be1, m1, v1 = bn(ks[2], ks[3], ks[4], ks[5], mlp_dim1)
    w2, b2 = lin(ks[6], ks[7], mlp_dim1, mlp_dim2)
    g2, be2, m2, v2 = bn(ks[8], ks[9], ks[10], ks[11], mlp_dim2)
    wl, bl = lin(ks[12], ks[13], llm_hidden, llm_proj_dim)
    fused_dim = mlp_dim2 + llm_proj_dim
    gf, bef, mf, vf = bn(ks[14], ks[15], ks[0], ks[1], fused_dim)
    wo, bo = lin(ks[2], ks[3], fused_dim, 2)
    return dict(w1=w1, b1=b1, g1=g1, be1=be1, m1=m1, v1=v1,
                w2=w2, b2=b2, g2=g2, be2=be2, m2=m2, v2=v2,
                wl=wl, bl=bl, gf=gf, bef=bef, mf=mf, vf=vf,
                wo=wo, bo=bo)


def _bn_eval(x, gamma, beta, mean, var):
    return gamma * (x - mean) * jax.lax.rsqrt(var + EPS) + beta


def fusion_reference(x, llm, p):
    """Pure-jnp fp32 reference matching the PyTorch eval-mode forward (unfolded)."""
    h1 = jnp.maximum(_bn_eval(x @ p["w1"] + p["b1"], p["g1"], p["be1"], p["m1"], p["v1"]), 0.0)
    h2 = jnp.maximum(_bn_eval(h1 @ p["w2"] + p["b2"], p["g2"], p["be2"], p["m2"], p["v2"]), 0.0)
    lp = llm @ p["wl"] + p["bl"]
    f = _bn_eval(jnp.concatenate([h2, lp], axis=1), p["gf"], p["bef"], p["mf"], p["vf"])
    return f @ p["wo"] + p["bo"]


# ----------------------------------------------------------------------------- main
if __name__ == "__main__":
    MLP_INPUT_DIM = 32
    MLP_DIM1 = 128
    MLP_DIM2 = 64
    LLM_PROJ_DIM = 64
    LLM_HIDDEN = 896   # fixed by `nn.Linear(896, llm_proj_dim)` in the module
    SEQ = 8

    key = jax.random.PRNGKey(0)
    k_x, k_llm, k_ids, k_p = jax.random.split(key, 4)

    params = make_params(k_p, MLP_INPUT_DIM, MLP_DIM1, MLP_DIM2, LLM_PROJ_DIM, LLM_HIDDEN)
    folded = fold_params(params)

    # --------------------------- case 1: small batch, single grid step
    B = 8
    x_tabular = jax.random.normal(k_x, (B, MLP_INPUT_DIM), dtype=jnp.float32)
    input_ids = jax.random.randint(k_ids, (B, SEQ), 0, 1000, dtype=jnp.int32)
    attention_mask = jnp.ones((B, SEQ), dtype=jnp.int32)

    # Deterministic stand-in for llm(...).hidden_states[-1][:, -1, :]  (shape [B, 896]).
    # TODO(synk): real frozen-LLM transformer forward is not translated; feature synthesized.
    _ = (input_ids, attention_mask)
    llm_last_hidden = jax.random.normal(k_llm, (B, LLM_HIDDEN), dtype=jnp.float32)

    out = jax.block_until_ready(fusion_forward(x_tabular, llm_last_hidden, folded))
    ref = fusion_reference(x_tabular, llm_last_hidden, params)
    assert out.shape == (B, 2)
    # Tolerance covers the bf16 cast of the MXU operands (x, llm, folded weights);
    # everything else is an exact fp32 algebraic refactoring of the eval-mode forward.
    assert jnp.allclose(out, ref, atol=1e-2, rtol=1e-2), (
        f"max abs err = {jnp.max(jnp.abs(out - ref))}")

    # --------------------------- case 2: ragged batch (B % tb != 0, B % 8 != 0)
    # exercises the masked last output block of the batch-tiled grid.
    B2 = 20
    x2 = jax.random.normal(jax.random.PRNGKey(1), (B2, MLP_INPUT_DIM), dtype=jnp.float32)
    llm2 = jax.random.normal(jax.random.PRNGKey(2), (B2, LLM_HIDDEN), dtype=jnp.float32)
    out2 = jax.block_until_ready(fusion_forward(x2, llm2, folded, batch_block=8))
    ref2 = fusion_reference(x2, llm2, params)
    assert out2.shape == (B2, 2)
    assert jnp.allclose(out2, ref2, atol=1e-2, rtol=1e-2), (
        f"ragged max abs err = {jnp.max(jnp.abs(out2 - ref2))}")

    print("KERNEL_OK")
</pallas_src>

<mosaic_0001>
module attributes {stable_mosaic.version = 11 : i64} {
  func.func @fusion_kernel(%arg0: i32, %arg1: memref<8x32xf32, #tpu.memory_space<vmem>>, %arg2: memref<8x896xf32, #tpu.memory_space<vmem>>, %arg3: memref<32x128xbf16, #tpu.memory_space<vmem>>, %arg4: memref<128x64xbf16, #tpu.memory_space<vmem>>, %arg5: memref<896x64xbf16, #tpu.memory_space<vmem>>, %arg6: memref<64x2xf32, #tpu.memory_space<vmem>>, %arg7: memref<64x2xf32, #tpu.memory_space<vmem>>, %arg8: memref<3x128xf32, #tpu.memory_space<vmem>>, %arg9: memref<8x2xf32, #tpu.memory_space<vmem>>) attributes {dimension_semantics = [#tpu.dimension_semantics<parallel>], iteration_bounds = array<i64: 1>, scalar_prefetch = 0 : i64, scratch_operands = 0 : i64, tpu.core_type = #tpu.core_type<tc>, window_params = [{transform_indices = @transform_0, window_bounds = array<i64: 8, 32>}, {transform_indices = @transform_1, window_bounds = array<i64: 8, 896>}, {pipeline_mode = #tpu.pipeline_mode<synchronous>, transform_indices = @transform_2, window_bounds = array<i64: 32, 128>}, {pipeline_mode = #tpu.pipeline_mode<synchronous>, transform_indices = @transform_3, window_bounds = array<i64: 128, 64>}, {pipeline_mode = #tpu.pipeline_mode<synchronous>, transform_indices = @transform_4, window_bounds = array<i64: 896, 64>}, {pipeline_mode = #tpu.pipeline_mode<synchronous>, transform_indices = @transform_5, window_bounds = array<i64: 64, 2>}, {pipeline_mode = #tpu.pipeline_mode<synchronous>, transform_indices = @transform_6, window_bounds = array<i64: 64, 2>}, {pipeline_mode = #tpu.pipeline_mode<synchronous>, transform_indices = @transform_7, window_bounds = array<i64: 3, 128>}, {transform_indices = @transform_8, window_bounds = array<i64: 8, 2>}]} {
    %c0 = arith.constant 0 : index
    %c0_0 = arith.constant 0 : index
    %0 = vector.load %arg1[%c0, %c0_0] : memref<8x32xf32, #tpu.memory_space<vmem>>, vector<8x32xf32>
    %1 = arith.truncf %0 : vector<8x32xf32> to vector<8x32xbf16>
    %c0_1 = arith.constant 0 : index
    %c0_2 = arith.constant 0 : index
    %2 = vector.load %arg2[%c0_1, %c0_2] : memref<8x896xf32, #tpu.memory_space<vmem>>, vector<8x896xf32>
    %3 = arith.truncf %2 : vector<8x896xf32> to vector<8x896xbf16>
    %c0_3 = arith.constant 0 : index
    %c0_4 = arith.constant 0 : index
    %4 = vector.load %arg8[%c0_3, %c0_4] : memref<3x128xf32, #tpu.memory_space<vmem>>, vector<1x128xf32>
    %c1 = arith.constant 1 : index
    %c0_5 = arith.constant 0 : index
    %5 = vector.load %arg8[%c1, %c0_5] : memref<3x128xf32, #tpu.memory_space<vmem>>, vector<1x64xf32>
    %c2 = arith.constant 2 : index
    %c0_6 = arith.constant 0 : index
    %6 = vector.load %arg8[%c2, %c0_6] : memref<3x128xf32, #tpu.memory_space<vmem>>, vector<1x2xf32>
    %c0_7 = arith.constant 0 : index
    %c0_8 = arith.constant 0 : index
    %7 = vector.load %arg3[%c0_7, %c0_8] : memref<32x128xbf16, #tpu.memory_space<vmem>>, vector<32x128xbf16>
    %cst = arith.constant dense<0.000000e+00> : vector<8x128xf32>
    %8 = tpu.matmul %1, %7, %cst {dimension_numbers = #tpu.dot_dimension_numbers<[1], [0], [0], [1], [0, 0, 1, 1], [], []>} : vector<8x32xbf16>, vector<32x128xbf16>, vector<8x128xf32> -> vector<8x128xf32>
    %9 = vector.broadcast %4 : vector<1x128xf32> to vector<8x128xf32>
    %10 = arith.addf %8, %9 : vector<8x128xf32>
    %cst_9 = arith.constant 0.000000e+00 : f32
    %11 = vector.broadcast %cst_9 : f32 to vector<8x128xf32>
    %12 = arith.maximumf %10, %11 : vector<8x128xf32>
    %13 = arith.truncf %12 : vector<8x128xf32> to vector<8x128xbf16>
    %c0_10 = arith.constant 0 : index
    %c0_11 = arith.constant 0 : index
    %14 = vector.load %arg4[%c0_10, %c0_11] : memref<128x64xbf16, #tpu.memory_space<vmem>>, vector<128x64xbf16>
    %cst_12 = arith.constant dense<0.000000e+00> : vector<8x64xf32>
    %15 = tpu.matmul %13, %14, %cst_12 {dimension_numbers = #tpu.dot_dimension_numbers<[1], [0], [0], [1], [0, 0, 1, 1], [], []>} : vector<8x128xbf16>, vector<128x64xbf16>, vector<8x64xf32> -> vector<8x64xf32>
    %16 = vector.broadcast %5 : vector<1x64xf32> to vector<8x64xf32>
    %17 = arith.addf %15, %16 : vector<8x64xf32>
    %cst_13 = arith.constant 0.000000e+00 : f32
    %18 = vector.broadcast %cst_13 : f32 to vector<8x64xf32>
    %19 = arith.maximumf %17, %18 : vector<8x64xf32>
    %c0_14 = arith.constant 0 : index
    %c0_15 = arith.constant 0 : index
    %20 = vector.load %arg5[%c0_14, %c0_15] : memref<896x64xbf16, #tpu.memory_space<vmem>>, vector<896x64xbf16>
    %cst_16 = arith.constant dense<0.000000e+00> : vector<8x64xf32>
    %21 = tpu.matmul %3, %20, %cst_16 {dimension_numbers = #tpu.dot_dimension_numbers<[1], [0], [0], [1], [0, 0, 1, 1], [], []>} : vector<8x896xbf16>, vector<896x64xbf16>, vector<8x64xf32> -> vector<8x64xf32>
    %c0_17 = arith.constant 0 : index
    %c0_18 = arith.constant 0 : index
    %22 = vector.load %arg6[%c0_17, %c0_18] : memref<64x2xf32, #tpu.memory_space<vmem>>, vector<64x2xf32>
    %cst_19 = arith.constant dense<0.000000e+00> : vector<8x2xf32>
    %23 = tpu.matmul %19, %22, %cst_19 {dimension_numbers = #tpu.dot_dimension_numbers<[1], [0], [0], [1], [0, 0, 1, 1], [], []>} : vector<8x64xf32>, vector<64x2xf32>, vector<8x2xf32> -> vector<8x2xf32>
    %c0_20 = arith.constant 0 : index
    %c0_21 = arith.constant 0 : index
    %24 = vector.load %arg7[%c0_20, %c0_21] : memref<64x2xf32, #tpu.memory_space<vmem>>, vector<64x2xf32>
    %cst_22 = arith.constant dense<0.000000e+00> : vector<8x2xf32>
    %25 = tpu.matmul %21, %24, %cst_22 {dimension_numbers = #tpu.dot_dimension_numbers<[1], [0], [0], [1], [0, 0, 1, 1], [], []>} : vector<8x64xf32>, vector<64x2xf32>, vector<8x2xf32> -> vector<8x2xf32>
    %26 = arith.addf %23, %25 : vector<8x2xf32>
    %27 = vector.broadcast %6 : vector<1x2xf32> to vector<8x2xf32>
    %28 = arith.addf %26, %27 : vector<8x2xf32>
    %c0_23 = arith.constant 0 : index
    %c0_24 = arith.constant 0 : index
    %29 = vector.load %arg9[%c0_23, %c0_24] : memref<8x2xf32, #tpu.memory_space<vmem>>, vector<8x2xf32>
    tpu.vector_store %arg9[%c0_23, %c0_24], %28 {strides = array<i32>} : memref<8x2xf32, #tpu.memory_space<vmem>>, vector<8x2xf32>,
    return
  }
  func.func @transform_0(%arg0: i32) -> (i32, i32) {
    %c0_i32 = arith.constant 0 : i32
    %c0_i32_0 = arith.constant 0 : i32
    return %arg0, %c0_i32 : i32, i32
  }
  func.func @transform_1(%arg0: i32) -> (i32, i32) {
    %c0_i32 = arith.constant 0 : i32
    %c0_i32_0 = arith.constant 0 : i32
    return %arg0, %c0_i32 : i32, i32
  }
  func.func @transform_2(%arg0: i32) -> (i32, i32) {
    %c0_i32 = arith.constant 0 : i32
    %c0_i32_0 = arith.constant 0 : i32
    %c0_i32_1 = arith.constant 0 : i32
    return %c0_i32, %c0_i32_0 : i32, i32
  }
  func.func @transform_3(%arg0: i32) -> (i32, i32) {
    %c0_i32 = arith.constant 0 : i32
    %c0_i32_0 = arith.constant 0 : i32
    %c0_i32_1 = arith.constant 0 : i32
    return %c0_i32, %c0_i32_0 : i32, i32
  }
  func.func @transform_4(%arg0: i32) -> (i32, i32) {
    %c0_i32 = arith.constant 0 : i32
    %c0_i32_0 = arith.constant 0 : i32
    %c0_i32_1 = arith.constant 0 : i32
    return %c0_i32, %c0_i32_0 : i32, i32
  }
  func.func @transform_5(%arg0: i32) -> (i32, i32) {
    %c0_i32 = arith.constant 0 : i32
    %c0_i32_0 = arith.constant 0 : i32
    %c0_i32_1 = arith.constant 0 : i32
    return %c0_i32, %c0_i32_0 : i32, i32
  }
  func.func @transform_6(%arg0: i32) -> (i32, i32) {
    %c0_i32 = arith.constant 0 : i32
    %c0_i32_0 = arith.constant 0 : i32
    %c0_i32_1 = arith.constant 0 : i32
    return %c0_i32, %c0_i32_0 : i32, i32
  }
  func.func @transform_7(%arg0: i32) -> (i32, i32) {
    %c0_i32 = arith.constant 0 : i32
    %c0_i32_0 = arith.constant 0 : i32
    %c0_i32_1 = arith.constant 0 : i32
    return %c0_i32, %c0_i32_0 : i32, i32
  }
  func.func @transform_8(%arg0: i32) -> (i32, i32) {
    %c0_i32 = arith.constant 0 : i32
    %c0_i32_0 = arith.constant 0 : i32
    return %arg0, %c0_i32 : i32, i32
  }
}

</mosaic_0001>

<bundles_post_ra>
// kernel: tpu_custom_call.1
= control target key start
LH: loop header
LB: loop body
LE: loop exit
PB: predicated region body
PF: predicated region fallthrough
CT: control target
= control target key end

     0   :  { %v1337_v0 = vmov 0.0   ;;  %vm1338_vm0 = vmmov 0   ;;  %vm69_vm1 = vcmask 261120   ;;  %vm848_vm2 = vcmask 523264   ;;  %s1712_s2 = inlined_call_operand.vmem [shape: bf16[32,128], index: 2, kind: input, shape index: {}]   ;;  %s1713_s0 = inlined_call_operand.vmem [shape: f32[8,32], index: 0, kind: input, shape index: {}]   ;;  %s1714_s3 = inlined_call_operand.vmem [shape: bf16[128,64], index: 3, kind: input, shape index: {}]   ;;  %s1715_s4 = inlined_call_operand.vmem [shape: bf16[896,64], index: 4, kind: input, shape index: {}]   ;;  %s1716_s1 = inlined_call_operand.vmem [shape: f32[8,896], index: 1, kind: input, shape index: {}]   ;;  %s1717_s7 = inlined_call_operand.vmem [shape: f32[3,128], index: 7, kind: input, shape index: {}]   ;;  %s1718_s6 = inlined_call_operand.vmem [shape: f32[64,2], index: 6, kind: input, shape index: {}]   ;;  %s1719_s5 = inlined_call_operand.vmem [shape: f32[64,2], index: 5, kind: input, shape index: {}]   ;;  %s1720_s8 = inlined_call_operand.vmem [shape: f32[8,2], index: 8, kind: output, shape index: {}]  }
   0x1   :  { %1183 = vmatprep.subr.bf16.mxu0 %v1337_v0  ;;  %v1271_v1 = vld [vmem:[%s1712_s2 + $0x8] sm:$0xff]   ;;  %1187 = vmatprep.mubr.msk.bf16.mxu0 %vm1338_vm0, %v1337_v0  ;;  %v1272_v2 = vld [vmem:[%s1712_s2] sm:$0xff]   ;;  %v1273_v4 = vld [vmem:[%s1714_s3 + $0x38] sm:$0xff]   ;;  %vm1000_vm3 = vcmask 15360  }
   0x2   :  { %1191 = vmatprep.subr.bf16.mxu1 %v1337_v0  ;;  %1207 = vmatprep.mubr.msk.bf16.mxu1 %vm1338_vm0, %v1337_v0  ;;  %v30_v3 = vld [vmem:[%s1713_s0] sm:$0xff]  ;;  %v1274_v5 = vld [vmem:[%s1715_s4 + $0x78] sm:$0xff]   ;;  %v1276_v8 = vld [vmem:[%s1714_s3 + $0x30] sm:$0xff]  }
   0x3   :  { %1184 = vmatpush3.bf16.msra.mxu0 %v1271_v1  ;;  %v31_v6 = vpack.c.bf16 %v30_v3, %v30_v3  ;;  %1192 = vmatpush3.bf16.msra.mxu1 %v1273_v4  ;;  %v1275_v7 = vld [vmem:[%s1715_s4 + $0x38] sm:$0xff]   ;;  %v1277_v9 = vld [vmem:[%s1715_s4 + $0x70] sm:$0xff]   ;;  %v1279_v10 = vld [vmem:[%s1714_s3 + $0x28] sm:$0xff]  }
   0x4   :  { %1185 = vmatprep.subr.bf16.mxu0 %v1337_v0  ;;  %1193 = vmatprep.subr.bf16.mxu1 %v1337_v0  ;;  %v1278_v11 = vld [vmem:[%s1715_s4 + $0x30] sm:$0xff]   ;;  %v1280_v12 = vld [vmem:[%s1715_s4 + $0x68] sm:$0xff]   ;;  %v1282_v13 = vld [vmem:[%s1714_s3 + $0x20] sm:$0xff]  }
   0x5   :  { %v1281_v14 = vld [vmem:[%s1715_s4 + $0x28] sm:$0xff]   ;;  %v1283_v15 = vld [vmem:[%s1715_s4 + $0x60] sm:$0xff]   ;;  %v1285_v16 = vld [vmem:[%s1714_s3 + $0x18] sm:$0xff]  }
   0x6   :  { %v1284_v17 = vld [vmem:[%s1715_s4 + $0x20] sm:$0xff]   ;;  %v1286_v18 = vld [vmem:[%s1715_s4 + $0x58] sm:$0xff]   ;;  %v1288_v20 = vld [vmem:[%s1714_s3 + $0x10] sm:$0xff]  }
   0x7   :  { %1186 = vmatpush3.bf16.msra.mxu0 %v1272_v2  ;;  %1194 = vmatpush3.bf16.msra.mxu1 %v1276_v8  ;;  %v1287_v19 = vld [vmem:[%s1715_s4 + $0x18] sm:$0xff]   ;;  %v1289_v21 = vld [vmem:[%s1715_s4 + $0x50] sm:$0xff]   ;;  %v1291_v22 = vld [vmem:[%s1714_s3 + $0x8] sm:$0xff]  }
   0x8   :  { %1090 = vmatprep.subr.bf16.mxu0 %v1274_v5  ;;  %1195 = vmatprep.subr.bf16.mxu1 %v1337_v0  ;;  %v1290_v23 = vld [vmem:[%s1715_s4 + $0x10] sm:$0xff]   ;;  %v1292_v24 = vld [vmem:[%s1715_s4 + $0x48] sm:$0xff]   ;;  %v1294_v26 = vld [vmem:[%s1714_s3] sm:$0xff]  }
   0x9   :  { %v1293_v25 = vld [vmem:[%s1715_s4 + $0x8] sm:$0xff]   ;;  %v1295_v27 = vld [vmem:[%s1715_s4 + $0x40] sm:$0xff]   ;;  %v1297_v29 = vld [vmem:[%s1715_s4 + $0xf8] sm:$0xff]  }
   0xa   :  { %1188 = vmatmul.mubr.msk.bf16.vlgmr.msra.gmra.mxu0 %vm69_vm1, %v31_v6  ;;  %v1296_v28 = vld [vmem:[%s1715_s4] sm:$0xff]   ;;  %v33_v30 = vld [vmem:[%s1716_s1 + $0x8] sm:$0xff]  ;;  %v1299_v32 = vld [vmem:[%s1715_s4 + $0x178] sm:$0xff]  }
   0xb   :  { %1091 = vmatpush3.bf16.msra.mxu0 %v1275_v7  ;;  %1196 = vmatpush3.bf16.msra.mxu1 %v1279_v10  ;;  %v40_v31 = vpack.c.bf16 %v33_v30, %v33_v30  ;;  %v32_v33 = vld [vmem:[%s1716_s1] sm:$0xff]  ;;  %v1300_v35 = vld [vmem:[%s1715_s4 + $0x138] sm:$0xff]   ;;  %v1303_v36 = vld [vmem:[%s1715_s4 + $0x170] sm:$0xff]  }
   0xc   :  { %1092 = vmatprep.subr.bf16.mxu0 %v1277_v9  ;;  %1197 = vmatprep.subr.bf16.mxu1 %v1337_v0  ;;  %v39_v34 = vpack.c.bf16 %v32_v33, %v32_v33  ;;  %v1304_v37 = vld [vmem:[%s1715_s4 + $0x130] sm:$0xff]   ;;  %v1307_v38 = vld [vmem:[%s1715_s4 + $0x168] sm:$0xff]   ;;  %v1311_v40 = vld [vmem:[%s1715_s4 + $0x160] sm:$0xff]  }
   0xd   :  { %704 = vmatprep.mubr.bf16.mxu0 %v40_v31  ;;  %v1308_v39 = vld [vmem:[%s1715_s4 + $0x128] sm:$0xff]   ;;  %v1312_v41 = vld [vmem:[%s1715_s4 + $0x120] sm:$0xff]   ;;  %v1315_v42 = vld [vmem:[%s1715_s4 + $0x158] sm:$0xff]  }
   0xe   :  { %v1316_v43 = vld [vmem:[%s1715_s4 + $0x118] sm:$0xff]   ;;  %v1319_v44 = vld [vmem:[%s1715_s4 + $0x150] sm:$0xff]   ;;  %v1323_v46 = vld [vmem:[%s1715_s4 + $0x148] sm:$0xff]  }
   0xf   :  { %1093 = vmatpush3.bf16.msra.mxu0 %v1278_v11  ;;  %1198 = vmatpush3.bf16.msra.mxu1 %v1282_v13  ;;  %v1320_v45 = vld [vmem:[%s1715_s4 + $0x110] sm:$0xff]   ;;  %v1324_v47 = vld [vmem:[%s1715_s4 + $0x108] sm:$0xff]   ;;  %v1327_v48 = vld [vmem:[%s1715_s4 + $0x140] sm:$0xff]  }
  0x10   :  { %1094 = vmatprep.subr.bf16.mxu0 %v1280_v12  ;;  %1199 = vmatprep.subr.bf16.mxu1 %v1337_v0  ;;  %v1328_v49 = vld [vmem:[%s1715_s4 + $0x100] sm:$0xff]   ;;  %v37_v50 = vld [vmem:[%s1716_s1 + $0x28] sm:$0xff]  ;;  %v35_v57 = vld [vmem:[%s1716_s1 + $0x18] sm:$0xff] }
  0x11   :  { %v44_v51 = vpack.c.bf16 %v37_v50, %v37_v50  ;;  %v36_v52 = vld [vmem:[%s1716_s1 + $0x20] sm:$0xff]  ;;  %v1298_v61 = vld [vmem:[%s1715_s4 + $0xb8] sm:$0xff]   ;;  %v42_v62 = vpack.c.bf16 %v35_v57, %v35_v57  ;;  %v1301_v1 = vld [vmem:[%s1715_s4 + $0xf0] sm:$0xff]  }
  0x12   :  { %v43_v53 = vpack.c.bf16 %v36_v52, %v36_v52  ;;  %v1006_v54 = vld [vmem:[%s1717_s7] ss:$0 sm:$0xff]  ;;  %v1302_v3 = vld [vmem:[%s1715_s4 + $0xb0] sm:$0xff]   ;;  %v1305_v4 = vld [vmem:[%s1715_s4 + $0xe8] sm:$0xff]  }
  0x13   :  { %1095 = vmatpush3.bf16.msra.mxu0 %v1281_v14  ;;  %1200 = vmatpush3.bf16.msra.mxu1 %v1285_v16  ;;  %v1306_v5 = vld [vmem:[%s1715_s4 + $0xa8] sm:$0xff]   ;;  %v1309_v6 = vld [vmem:[%s1715_s4 + $0xe0] sm:$0xff]   ;;  %v1313_v8 = vld [vmem:[%s1715_s4 + $0xd8] sm:$0xff]  }
  0x14   :  { %1096 = vmatprep.subr.bf16.mxu0 %v1283_v15  ;;  %1201 = vmatprep.subr.bf16.mxu1 %v1337_v0  ;;  %v1310_v7 = vld [vmem:[%s1715_s4 + $0xa0] sm:$0xff]   ;;  %v1314_v9 = vld [vmem:[%s1715_s4 + $0x98] sm:$0xff]   ;;  %v1317_v10 = vld [vmem:[%s1715_s4 + $0xd0] sm:$0xff]  }
  0x15   :  { %v1318_v11 = vld [vmem:[%s1715_s4 + $0x90] sm:$0xff]   ;;  %v1321_v12 = vld [vmem:[%s1715_s4 + $0xc8] sm:$0xff]   ;;  %v1325_v14 = vld [vmem:[%s1715_s4 + $0xc0] sm:$0xff]  }
  0x16   :  { %v1322_v13 = vld [vmem:[%s1715_s4 + $0x88] sm:$0xff]   ;;  %v1326_v15 = vld [vmem:[%s1715_s4 + $0x80] sm:$0xff]   ;;  %v34_v16 = vld [vmem:[%s1716_s1 + $0x10] sm:$0xff] }
  0x17   :  { %1097 = vmatpush3.bf16.msra.mxu0 %v1284_v17  ;;  %1202 = vmatpush3.bf16.msra.mxu1 %v1288_v20  ;;  %v41_v17 = vpack.c.bf16 %v34_v16, %v34_v16  ;;  %v1331_v20 = vld [vmem:[%s1715_s4 + $0x1a8] sm:$0xff]  }
  0x18   :  { %1098 = vmatprep.subr.bf16.mxu0 %v1286_v18  ;;  %1203 = vmatprep.subr.bf16.mxu1 %v1337_v0  ;;  %v1329_v18 = vld [vmem:[%s1715_s4 + $0x1b8] sm:$0xff]  }
  0x1b   :  { %1099 = vmatpush3.bf16.msra.mxu0 %v1287_v19  ;;  %1204 = vmatpush3.bf16.msra.mxu1 %v1291_v22  ;;  %v1330_v19 = vld [vmem:[%s1715_s4 + $0x1b0] sm:$0xff]   ;;  %v1333_v22 = vld [vmem:[%s1715_s4 + $0x198] sm:$0xff]  }
  0x1c   :  { %1100 = vmatprep.subr.bf16.mxu0 %v1289_v21  ;;  %1205 = vmatprep.subr.bf16.mxu1 %v1337_v0  ;;  %v1332_v21 = vld [vmem:[%s1715_s4 + $0x1a0] sm:$0xff]  }
  0x1f   :  { %1101 = vmatpush3.bf16.msra.mxu0 %v1290_v23  ;;  %1206 = vmatpush3.bf16.msra.mxu1 %v1294_v26  ;;  %v1334_v23 = vld [vmem:[%s1715_s4 + $0x190] sm:$0xff]  }
  0x20   :  { %1102 = vmatprep.subr.bf16.mxu0 %v1292_v24  ;;  %1112 = vmatprep.subr.bf16.mxu1 %v1297_v29  ;;  %v1335_v24 = vld [vmem:[%s1715_s4 + $0x188] sm:$0xff]   ;;  %v38_v26 = vld [vmem:[%s1716_s1 + $0x30] sm:$0xff] }
  0x23   :  { %1103 = vmatpush3.bf16.msra.mxu0 %v1293_v25  ;;  %v1336_v25 = vld [vmem:[%s1715_s4 + $0x180] sm:$0xff]  }
  0x24   :  { %1104 = vmatprep.subr.bf16.mxu0 %v1295_v27  ;;  %v45_v27 = vpack.c.bf16 %v38_v26, %v38_v26 }
  0x27   :  { %1105 = vmatpush3.bf16.msra.mxu0 %v1296_v28 }
  0x28   :  { %1134 = vmatprep.subr.bf16.mxu0 %v1299_v32 }
  0x2a   :  { %705 = vmatmul.mubr.bf16.vlgmr.msra.gmra.mxu0 %v39_v34 }
  0x2b   :  { %1135 = vmatpush3.bf16.msra.mxu0 %v1300_v35  ;;  %784 = vmatprep.mubr.bf16.mxu0 %v44_v51 }
  0x2c   :  { %1136 = vmatprep.subr.bf16.mxu0 %v1303_v36  ;;  %v847_v36 = vld [vmem:[%s1718_s6 + $0x38] sm:$0xff] }
  0x2f   :  { %1137 = vmatpush3.bf16.msra.mxu0 %v1304_v37  ;;  %v846_v37 = vld [vmem:[%s1718_s6 + $0x30] sm:$0xff] }
  0x30   :  { %1138 = vmatprep.subr.bf16.mxu0 %v1307_v38 }
  0x33   :  { %1139 = vmatpush3.bf16.msra.mxu0 %v1308_v39  ;;  %v845_v39 = vld [vmem:[%s1718_s6 + $0x28] sm:$0xff] }
  0x34   :  { %1140 = vmatprep.subr.bf16.mxu0 %v1311_v40 }
  0x37   :  { %1141 = vmatpush3.bf16.msra.mxu0 %v1312_v41  ;;  %v844_v41 = vld [vmem:[%s1718_s6 + $0x20] sm:$0xff] }
  0x38   :  { %1142 = vmatprep.subr.bf16.mxu0 %v1315_v42  ;;  %v843_v42 = vld [vmem:[%s1718_s6 + $0x18] sm:$0xff] }
  0x3b   :  { %1143 = vmatpush3.bf16.msra.mxu0 %v1316_v43  ;;  %v842_v43 = vld [vmem:[%s1718_s6 + $0x10] sm:$0xff] }
  0x3c   :  { %1144 = vmatprep.subr.bf16.mxu0 %v1319_v44  ;;  %v841_v44 = vld [vmem:[%s1718_s6 + $0x8] sm:$0xff] }
  0x3f   :  { %1145 = vmatpush3.bf16.msra.mxu0 %v1320_v45  ;;  %v840_v45 = vld [vmem:[%s1718_s6] sm:$0xff] }
  0x40   :  { %1146 = vmatprep.subr.bf16.mxu0 %v1323_v46 }
  0x43   :  { %1147 = vmatpush3.bf16.msra.mxu0 %v1324_v47 }
  0x44   :  { %1148 = vmatprep.subr.bf16.mxu0 %v1327_v48 }
  0x47   :  { %1149 = vmatpush3.bf16.msra.mxu0 %v1328_v49 }
  0x48   :  { %1231 = vmatprep.subr.mxu0 %v1337_v0 }
  0x4a   :  { %785 = vmatmul.mubr.bf16.vlgmr.msra.gmra.mxu0 %v43_v53 }
  0x4b   :  { %1247 = vmatprep.mubr.msk.f32.mxu0 %vm1338_vm0, %v1337_v0  ;;  %1232 = vmatpush3.msra.mxu0 %v847_v36 }
  0x4c   :  { %1233 = vmatprep.subr.mxu0 %v1337_v0 }
  0x4d   :  { %1234 = vmatpush3.msra.mxu0 %v846_v37 }
  0x4e   :  { %1235 = vmatprep.subr.mxu0 %v1337_v0 }
  0x4f   :  { %1236 = vmatpush3.msra.mxu0 %v845_v39 }
  0x50   :  { %1237 = vmatprep.subr.mxu0 %v1337_v0 }
  0x51   :  { %1238 = vmatpush3.msra.mxu0 %v844_v41 }
  0x52   :  { %1239 = vmatprep.subr.mxu0 %v1337_v0 }
  0x53   :  { %1240 = vmatpush3.msra.mxu0 %v843_v42 }
  0x54   :  { %1241 = vmatprep.subr.mxu0 %v1337_v0 }
  0x55   :  { %1242 = vmatpush3.msra.mxu0 %v842_v43 }
  0x56   :  { %1243 = vmatprep.subr.mxu0 %v1337_v0 }
  0x57   :  { %1244 = vmatpush3.msra.mxu0 %v841_v44 }
  0x58   :  { %1245 = vmatprep.subr.mxu0 %v1337_v0 }
  0x59   :  { %1246 = vmatpush3.msra.mxu0 %v840_v45 }
  0x5a   :  { %1250 = vmatprep.subr.mxu0 %v1337_v0 }
  0xca   :  { %v107_v55 = vpop.f32.mrf.mxu0 }
  0xcb   :  { %v108_v56 = vadd.f32 %v1006_v54, %v107_v55 }
  0xcc   :  { %v1189_v58 = vpop.f32.mrf.mxu0 }
  0xcd   :  { %v113_v59 = vmax.f32 %v108_v56, 0.0 }
  0xce   :  { %v110_v60 = vpop.f32.mrf.mxu0 }
  0xcf   :  { %v114_v63 = vpack.c.bf16 %v113_v59, %v113_v59  ;;  %v839_v59 = vld [vmem:[%s1719_s5 + $0x38] sm:$0xff] }
  0xd0   :  { %v1190_v2 = vpop.f32.mrf.mxu0 }
  0xd1   :  { %1208 = vmatmul.mubr.bf16.vlgmr.msra.gmra.mxu1 %v114_v63  ;;  %v837_v63 = vld [vmem:[%s1719_s5 + $0x28] sm:$0xff]  ;;  %v836_v2 = vld [vmem:[%s1719_s5 + $0x20] sm:$0xff] }
  0xd2   :  { %1113 = vmatpush3.bf16.msra.mxu1 %v1298_v61  ;;  %744 = vmatprep.mubr.bf16.mxu1 %v42_v62  ;;  %v838_v61 = vld [vmem:[%s1719_s5 + $0x30] sm:$0xff] }
  0xd3   :  { %1114 = vmatprep.subr.bf16.mxu1 %v1301_v1 }
  0xd6   :  { %1115 = vmatpush3.bf16.msra.mxu1 %v1302_v3  ;;  %v835_v3 = vld [vmem:[%s1719_s5 + $0x18] sm:$0xff] }
  0xd7   :  { %1116 = vmatprep.subr.bf16.mxu1 %v1305_v4  ;;  %v1010_v4 = vld [vmem:[%s1717_s7 + $0x1] ss:$0 sm:$0xff] }
  0xda   :  { %1117 = vmatpush3.bf16.msra.mxu1 %v1306_v5  ;;  %v834_v5 = vld [vmem:[%s1719_s5 + $0x10] sm:$0xff] }
  0xdb   :  { %1118 = vmatprep.subr.bf16.mxu1 %v1309_v6 }
  0xde   :  { %1119 = vmatpush3.bf16.msra.mxu1 %v1310_v7  ;;  %v833_v7 = vld [vmem:[%s1719_s5 + $0x8] sm:$0xff] }
  0xdf   :  { %1120 = vmatprep.subr.bf16.mxu1 %v1313_v8  ;;  %v832_v8 = vld [vmem:[%s1719_s5] sm:$0xff] }
  0xe2   :  { %1121 = vmatpush3.bf16.msra.mxu1 %v1314_v9 }
  0xe3   :  { %1122 = vmatprep.subr.bf16.mxu1 %v1317_v10 }
  0xe6   :  { %1123 = vmatpush3.bf16.msra.mxu1 %v1318_v11 }
  0xe7   :  { %1124 = vmatprep.subr.bf16.mxu1 %v1321_v12  ;;  %v1077_v12 = vld [vmem:[%s1717_s7 + $0x2] ss:$0 sm:$0xff] }
  0xea   :  { %1125 = vmatpush3.bf16.msra.mxu1 %v1322_v13  ;;  %v1106_v28 = vpop.f32.mrf.mxu0 }
  0xeb   :  { %1126 = vmatprep.subr.bf16.mxu1 %v1325_v14 }
  0xec   :  { %v1107_v29 = vpop.f32.mrf.mxu0 }
  0xed   :  { %v1108_v30 = vadd.f32 %v1107_v29, %v1106_v28 }
  0xee   :  { %1127 = vmatpush3.bf16.msra.mxu1 %v1326_v15  ;;  %v1109_v31 = vpop.f32.mrf.mxu0 }
  0xef   :  { %1211 = vmatprep.subr.bf16.mxu1 %v1337_v0 }
  0xf0   :  { %v1110_v32 = vpop.f32.mrf.mxu0 }
  0xf1   :  { %745 = vmatmul.mubr.bf16.vlgmr.msra.gmra.mxu1 %v41_v17 }
  0xf2   :  { %1212 = vmatpush3.bf16.msra.mxu1 %v1329_v18  ;;  %1227 = vmatprep.mubr.msk.bf16.mxu1 %vm1338_vm0, %v1337_v0 }
  0xf3   :  { %1213 = vmatprep.subr.bf16.mxu1 %v1337_v0 }
  0xf6   :  { %1214 = vmatpush3.bf16.msra.mxu1 %v1330_v19 }
  0xf7   :  { %1215 = vmatprep.subr.bf16.mxu1 %v1337_v0 }
  0xfa   :  { %1216 = vmatpush3.bf16.msra.mxu1 %v1331_v20 }
  0xfb   :  { %1217 = vmatprep.subr.bf16.mxu1 %v1337_v0 }
  0xfe   :  { %1218 = vmatpush3.bf16.msra.mxu1 %v1332_v21 }
  0xff   :  { %1219 = vmatprep.subr.bf16.mxu1 %v1337_v0 }
 0x102   :  { %1220 = vmatpush3.bf16.msra.mxu1 %v1333_v22 }
 0x103   :  { %1221 = vmatprep.subr.bf16.mxu1 %v1337_v0 }
 0x106   :  { %1222 = vmatpush3.bf16.msra.mxu1 %v1334_v23 }
 0x107   :  { %1223 = vmatprep.subr.bf16.mxu1 %v1337_v0 }
 0x10a   :  { %1224 = vmatpush3.bf16.msra.mxu1 %v1335_v24  ;;  %v1150_v33 = vpop.f32.mrf.mxu0 }
 0x10b   :  { %1225 = vmatprep.subr.bf16.mxu1 %v1337_v0 }
 0x10c   :  { %v1151_v34 = vpop.f32.mrf.mxu0 }
 0x10d   :  { %v1152_v35 = vadd.f32 %v1151_v34, %v1150_v33 }
 0x10e   :  { %1226 = vmatpush3.bf16.msra.mxu1 %v1336_v25  ;;  %v1153_v38 = vpop.f32.mrf.mxu0 }
 0x110   :  { %v1154_v40 = vpop.f32.mrf.mxu0 }
 0x111   :  { %1228 = vmatmul.mubr.bf16.vlgmr.msra.gmra.mxu1 %v45_v27 }
 0x191   :  { %v217_v46 = vpop.f32.mrf.mxu1 }
 0x192   :  { %v218_v6 = vadd.f32 %v1010_v4, %v217_v46 }
 0x193   :  { %v1209_v47 = vpop.f32.mrf.mxu1 }
 0x194   :  { %v223_v9 = vmax.f32 %v218_v6, 0.0 }
 0x195   :  { %v220_v48 = vpop.f32.mrf.mxu1 }
 0x197   :  { %v1210_v49 = vpop.f32.mrf.mxu1 }
 0x1b1   :  { %v1128_v50 = vpop.f32.mrf.mxu1 }
 0x1b3   :  { %v1129_v51 = vpop.f32.mrf.mxu1 }
 0x1b4   :  { %v1130_v52 = vadd.f32 %v1129_v51, %v1128_v50 }
 0x1b5   :  { %v1131_v53 = vpop.f32.mrf.mxu1 }
 0x1b6   :  { %v747_v54 = vadd.f32 %v1130_v52, %v1108_v30 }
 0x1b7   :  { %v1132_v55 = vpop.f32.mrf.mxu1 }
 0x1b8   :  { %v787_v56 = vadd.f32 %v1152_v35, %v747_v54 }
 0x1d1   :  { %v826_v57 = vpop.f32.mrf.mxu1 }
 0x1d2   :  { %v827_v58 = vadd.f32 %v826_v57, %v787_v56 }
 0x1d3   :  { %v1229_v60 = vpop.f32.mrf.mxu1 }
 0x1d4   :  { %1248 = vmatmul.mubr.msk.f32.vlgmr.msra.gmra.mxu0 %vm848_vm2, %v827_v58 }
 0x1d5   :  { %1251 = vmatpush3.msra.mxu0 %v839_v59  ;;  %v829_v62 = vpop.f32.mrf.mxu1  ;;  %1266 = vmatprep.mubr.msk.f32.mxu0 %vm1338_vm0, %v1337_v0 }
 0x1d6   :  { %1252 = vmatprep.subr.mxu0 %v1337_v0 }
 0x1d7   :  { %1253 = vmatpush3.msra.mxu0 %v838_v61  ;;  %v1230_v1 = vpop.f32.mrf.mxu1 }
 0x1d8   :  { %1254 = vmatprep.subr.mxu0 %v1337_v0 }
 0x1d9   :  { %1255 = vmatpush3.msra.mxu0 %v837_v63 }
 0x1da   :  { %1256 = vmatprep.subr.mxu0 %v1337_v0 }
 0x1db   :  { %1257 = vmatpush3.msra.mxu0 %v836_v2 }
 0x1dc   :  { %1258 = vmatprep.subr.mxu0 %v1337_v0 }
 0x1dd   :  { %1259 = vmatpush3.msra.mxu0 %v835_v3 }
 0x1de   :  { %1260 = vmatprep.subr.mxu0 %v1337_v0 }
 0x1df   :  { %1261 = vmatpush3.msra.mxu0 %v834_v5 }
 0x1e0   :  { %1262 = vmatprep.subr.mxu0 %v1337_v0 }
 0x1e1   :  { %1263 = vmatpush3.msra.mxu0 %v833_v7 }
 0x1e2   :  { %1264 = vmatprep.subr.mxu0 %v1337_v0 }
 0x1e3   :  { %1265 = vmatpush3.msra.mxu0 %v832_v8 }
 0x1e4   :  { %1267 = vmatmul.mubr.msk.f32.vlgmr.msra.gmra.mxu0 %vm848_vm2, %v223_v9 }
 0x294   :  { %v918_v10 = vpop.f32.mrf.mxu0 }
 0x296   :  { %v1249_v11 = vpop.f32.mrf.mxu0 }
 0x2a4   :  { %v991_v13 = vpop.f32.mrf.mxu0 }
 0x2a5   :  { %v992_v14 = vadd.f32 %v991_v13, %v918_v10 }
 0x2a6   :  { %v1268_v15 = vpop.f32.mrf.mxu0 }
 0x2a7   :  { %v999_v16 = vadd.f32 %v1077_v12, %v992_v14 }
 0x2a9   :  { %1001 = vst.msk [vmem:[%s1720_s8] sm:$0xff] %vm1000_vm3, %v999_v16 }

</bundles_post_ra>
